<compile_context>
chip_gen: v5e
topology: v5e:2x2
jax: 0.10.0
libtpu: 0.0.40
codegen_flags: <defaults>
</compile_context>

<pallas_src>
import jax
import jax.numpy as jnp
from jax.experimental import pallas as pl
from jax.experimental.pallas import tpu as pltpu


_H1, _H2 = 128, 64
_BN_EPS = 1e-5


def _round_up(x, m):
    return ((x + m - 1) // m) * m


def _vmem_tile_bytes(rows, cols, dtype):
    """Layout-padded VMEM footprint of a (rows, cols) buffer of `dtype`."""
    itemsize = jnp.dtype(dtype).itemsize
    sublane = (8 * 4) // itemsize            # f32 -> 8 rows/tile, bf16 -> 16
    return _round_up(max(rows, 1), sublane) * _round_up(max(cols, 1), 128) * itemsize


def _vmem_capacity_bytes():
    try:
        cap = getattr(pltpu.get_tpu_info(), "vmem_capacity_bytes", None)
        if cap:
            return int(cap)
    except Exception:
        pass
    return 64 << 20  # conservative fallback = v7x per-core physical VMEM


def _mlp_kernel(x_ref, w1_ref, b1_ref, w2_ref, b2_ref, w3_ref, b3_ref, o_ref):
    nc = o_ref.shape[1]

    # layer_1 + ReLU: bf16 MXU operands, f32 accumulation; elementwise in f32.
    h1 = jnp.dot(x_ref[...], w1_ref[...], preferred_element_type=jnp.float32)
    h1 = jnp.maximum(h1 + b1_ref[...], 0.0)

    # layer_2 + ReLU (BatchNorm1 pre-folded into w2/b2 on the host).
    h2 = jnp.dot(h1, w2_ref[...], preferred_element_type=jnp.float32)
    h2 = jnp.maximum(h2 + b2_ref[...], 0.0)

    # layer_out + sigmoid (BatchNorm2 folded into w3/b3; dropout = identity).
    # w3 is a 128-lane VMEM slab for the MXU; only the first `nc` logits are
    # biased, activated and stored (narrow HBM writeback).
    logits = jnp.dot(h2, w3_ref[...], preferred_element_type=jnp.float32)
    o_ref[...] = jax.nn.sigmoid(logits[:, :nc] + b3_ref[...]).astype(o_ref.dtype)


def binary_classification_forward(x, params, *, block_b=4096,
                                  io_dtype=jnp.bfloat16,
                                  out_dtype=jnp.float32):
    """x: (B, num_feature) float32. params: dict of weights (see init_params)."""
    B, F = x.shape
    num_class = params["w3"].shape[1]
    eps = jnp.float32(_BN_EPS)

    # ---- Fold eval-mode BatchNorms into the adjacent Linear layers (host side).
    s1 = params["g1"] * jax.lax.rsqrt(params["v1"] + eps)        # (1, 128)
    t1 = params["be1"] - params["m1"] * s1                       # (1, 128)
    w2f = params["w2"] * s1.reshape(-1, 1)                       # (128, 64)
    b2f = params["b2"] + t1 @ params["w2"]                       # (1, 64)

    s2 = params["g2"] * jax.lax.rsqrt(params["v2"] + eps)        # (1, 64)
    t2 = params["be2"] - params["m2"] * s2                       # (1, 64)
    w3f = params["w3"] * s2.reshape(-1, 1)                       # (64, C)
    b3f = params["b3"] + t2 @ params["w3"]                       # (1, C)

    # ---- 128-lane w3 slab for the MXU (VMEM only; HBM output stays C-wide).
    c_vmem = _round_up(max(num_class, 1), 128)
    if c_vmem != num_class:
        w3f = jnp.pad(w3f, ((0, 0), (0, c_vmem - num_class)))

    # ---- bf16 HBM I/O for the big read operand; accumulation stays f32.
    x_io = x.astype(io_dtype)
    w1 = params["w1"].astype(io_dtype)

    # ---- Pad batch only to a sublane multiple (<=7 junk rows); the cdiv grid
    #      below tolerates a ragged last block, so no tb-sized padding waste.
    b_pad = _round_up(B, 8)
    if b_pad != B:
        x_io = jnp.pad(x_io, ((0, b_pad - B), (0, 0)))

    # ---- Batch-tile selection from a VMEM budget (layout-padded estimate).
    def tile_bytes(rows):
        t = 2 * _vmem_tile_bytes(rows, F, io_dtype)               # x (dbl-buffered)
        t += 2 * _vmem_tile_bytes(rows, num_class, out_dtype)     # out (dbl-buffered)
        t += 2 * (_vmem_tile_bytes(F, _H1, io_dtype)              # resident params
                  + _vmem_tile_bytes(1, _H1, jnp.float32)
                  + _vmem_tile_bytes(_H1, _H2, jnp.float32)
                  + _vmem_tile_bytes(1, _H2, jnp.float32)
                  + _vmem_tile_bytes(_H2, c_vmem, jnp.float32)
                  + _vmem_tile_bytes(1, num_class, jnp.float32))
        t += (_vmem_tile_bytes(rows, _H1, jnp.float32)            # h1
              + _vmem_tile_bytes(rows, _H2, jnp.float32)          # h2
              + _vmem_tile_bytes(rows, c_vmem, jnp.float32))      # logits
        return t

    cap = _vmem_capacity_bytes()
    budget = int(0.75 * cap)       # ~25% headroom: never request full physical VMEM
    tb = min(_round_up(block_b, 8), b_pad)
    while tb > 8 and tile_bytes(tb) > budget:
        tb = max(8, _round_up(tb // 2, 8))
    # Keep >=2 grid steps when the batch allows, so v7x can shard the
    # "parallel" batch axis across both TensorCores.
    if b_pad >= 16:
        tb = min(tb, _round_up(pl.cdiv(b_pad, 2), 8))
    grid = (pl.cdiv(b_pad, tb),)

    vmem_limit = int(min(budget, max(tile_bytes(tb) + (4 << 20), 16 << 20)))

    x_bytes = jnp.dtype(io_dtype).itemsize
    o_bytes = jnp.dtype(out_dtype).itemsize
    rows_work = grid[0] * tb
    param_bytes = (F * _H1 * x_bytes
                   + (_H1 + _H1 * _H2 + _H2 + _H2 * c_vmem + num_class) * 4)
    cost = pl.CostEstimate(
        flops=2 * rows_work * (F * _H1 + _H1 * _H2 + _H2 * c_vmem),
        transcendentals=rows_work * num_class,
        bytes_accessed=b_pad * F * x_bytes + b_pad * num_class * o_bytes + param_bytes,
    )

    x_spec = pl.BlockSpec((tb, F), lambda i: (i, 0))
    out_spec = pl.BlockSpec((tb, num_class), lambda i: (i, 0))

    def resident(shape):
        # Constant index_map: block is fetched once and stays resident in VMEM.
        return pl.BlockSpec(shape, lambda i: (0, 0))

    out_pad = pl.pallas_call(
        _mlp_kernel,
        out_shape=jax.ShapeDtypeStruct((b_pad, num_class), out_dtype),
        grid=grid,
        in_specs=[
            x_spec,
            resident((F, _H1)), resident((1, _H1)),
            resident((_H1, _H2)), resident((1, _H2)),
            resident((_H2, c_vmem)), resident((1, num_class)),
        ],
        out_specs=out_spec,
        compiler_params=pltpu.CompilerParams(
            dimension_semantics=("parallel",),
            vmem_limit_bytes=vmem_limit,
        ),
        cost_estimate=cost,
    )(x_io, w1, params["b1"], w2f, b2f, w3f, b3f)

    return out_pad[:B, :]


def init_params(key, num_feature, num_class):
    """Deterministic synthetic parameters (shapes match the PyTorch module)."""
    ks = jax.random.split(key, 8)
    h1, h2 = _H1, _H2

    def lin(k, fan_in, fan_out):
        # weights stored as (in, out) so the kernel can do x @ W directly
        return 0.05 * jax.random.normal(k, (fan_in, fan_out), jnp.float32)

    params = {
        "w1": lin(ks[0], num_feature, h1),
        "b1": 0.01 * jax.random.normal(ks[1], (1, h1), jnp.float32),
        "w2": lin(ks[2], h1, h2),
        "b2": 0.01 * jax.random.normal(ks[3], (1, h2), jnp.float32),
        "w3": lin(ks[4], h2, num_class),
        "b3": 0.01 * jax.random.normal(ks[5], (1, num_class), jnp.float32),
        # BatchNorm1d(128) affine + running stats (eval mode)
        "g1": 1.0 + 0.1 * jax.random.normal(ks[6], (1, h1), jnp.float32),
        "be1": 0.01 * jnp.ones((1, h1), jnp.float32),
        "m1": 0.05 * jnp.ones((1, h1), jnp.float32),
        "v1": jnp.ones((1, h1), jnp.float32),
        # BatchNorm1d(64)
        "g2": 1.0 + 0.1 * jax.random.normal(ks[7], (1, h2), jnp.float32),
        "be2": 0.01 * jnp.ones((1, h2), jnp.float32),
        "m2": 0.05 * jnp.ones((1, h2), jnp.float32),
        "v2": jnp.ones((1, h2), jnp.float32),
    }
    return params


def _reference_forward(x, params, *, io_dtype=None):
    """Pure-JAX reference matching the PyTorch module (eval mode).

    With io_dtype=bfloat16 it mirrors the kernel's bf16 I/O cast of x/W1 so the
    comparison against the Pallas kernel can be tight.
    """
    eps = jnp.float32(_BN_EPS)
    w1 = params["w1"]
    if io_dtype is not None:
        x = x.astype(io_dtype)
        w1 = w1.astype(io_dtype)
    h = jnp.dot(x, w1, preferred_element_type=jnp.float32) + params["b1"]
    h = jnp.maximum(h, 0.0)
    h = (h - params["m1"]) * params["g1"] * jax.lax.rsqrt(params["v1"] + eps) + params["be1"]
    h = jnp.maximum(h @ params["w2"] + params["b2"], 0.0)
    h = (h - params["m2"]) * params["g2"] * jax.lax.rsqrt(params["v2"] + eps) + params["be2"]
    # dropout(p=0.1): identity at inference
    return jax.nn.sigmoid(h @ params["w3"] + params["b3"])


if __name__ == "__main__":
    key = jax.random.PRNGKey(0)
    k_x, k_p = jax.random.split(key)

    B, num_feature, num_class = 8, 32, 1
    x = jax.random.normal(k_x, (B, num_feature), jnp.float32)
    params = init_params(k_p, num_feature, num_class)

    out = jax.block_until_ready(binary_classification_forward(x, params))

    ref_f32 = _reference_forward(x, params)                           # exact module math
    ref_mix = _reference_forward(x, params, io_dtype=jnp.bfloat16)    # mirrors kernel I/O cast

    assert out.shape == (B, num_class)
    assert bool(jnp.all(jnp.isfinite(out)))
    assert bool(jnp.all((out >= 0.0) & (out <= 1.0)))
    assert bool(jnp.allclose(out, ref_mix, atol=2e-3, rtol=2e-3))
    assert bool(jnp.allclose(out, ref_f32, atol=2e-2, rtol=2e-2))

    print("KERNEL_OK")
</pallas_src>

<mosaic_0001>
module attributes {stable_mosaic.version = 11 : i64} {
  func.func @_mlp_kernel(%arg0: i32, %arg1: memref<8x32xbf16, #tpu.memory_space<vmem>>, %arg2: memref<32x128xbf16, #tpu.memory_space<vmem>>, %arg3: memref<1x128xf32, #tpu.memory_space<vmem>>, %arg4: memref<128x64xf32, #tpu.memory_space<vmem>>, %arg5: memref<1x64xf32, #tpu.memory_space<vmem>>, %arg6: memref<64x128xf32, #tpu.memory_space<vmem>>, %arg7: memref<1x1xf32, #tpu.memory_space<vmem>>, %arg8: memref<8x1xf32, #tpu.memory_space<vmem>>) attributes {dimension_semantics = [#tpu.dimension_semantics<parallel>], iteration_bounds = array<i64: 1>, scalar_prefetch = 0 : i64, scratch_operands = 0 : i64, tpu.core_type = #tpu.core_type<tc>, window_params = [{transform_indices = @transform_0, window_bounds = array<i64: 8, 32>}, {pipeline_mode = #tpu.pipeline_mode<synchronous>, transform_indices = @transform_1, window_bounds = array<i64: 32, 128>}, {pipeline_mode = #tpu.pipeline_mode<synchronous>, transform_indices = @transform_2, window_bounds = array<i64: 1, 128>}, {pipeline_mode = #tpu.pipeline_mode<synchronous>, transform_indices = @transform_3, window_bounds = array<i64: 128, 64>}, {pipeline_mode = #tpu.pipeline_mode<synchronous>, transform_indices = @transform_4, window_bounds = array<i64: 1, 64>}, {pipeline_mode = #tpu.pipeline_mode<synchronous>, transform_indices = @transform_5, window_bounds = array<i64: 64, 128>}, {pipeline_mode = #tpu.pipeline_mode<synchronous>, transform_indices = @transform_6, window_bounds = array<i64: 1, 1>}, {transform_indices = @transform_7, window_bounds = array<i64: 8, 1>}]} {
    %c0 = arith.constant 0 : index
    %c0_0 = arith.constant 0 : index
    %0 = vector.load %arg1[%c0, %c0_0] : memref<8x32xbf16, #tpu.memory_space<vmem>>, vector<8x32xbf16>
    %c0_1 = arith.constant 0 : index
    %c0_2 = arith.constant 0 : index
    %1 = vector.load %arg2[%c0_1, %c0_2] : memref<32x128xbf16, #tpu.memory_space<vmem>>, vector<32x128xbf16>
    %cst = arith.constant dense<0.000000e+00> : vector<8x128xf32>
    %2 = tpu.matmul %0, %1, %cst {dimension_numbers = #tpu.dot_dimension_numbers<[1], [0], [0], [1], [0, 0, 1, 1], [], []>} : vector<8x32xbf16>, vector<32x128xbf16>, vector<8x128xf32> -> vector<8x128xf32>
    %c0_3 = arith.constant 0 : index
    %c0_4 = arith.constant 0 : index
    %3 = vector.load %arg3[%c0_3, %c0_4] : memref<1x128xf32, #tpu.memory_space<vmem>>, vector<1x128xf32>
    %4 = vector.broadcast %3 : vector<1x128xf32> to vector<8x128xf32>
    %5 = arith.addf %2, %4 : vector<8x128xf32>
    %cst_5 = arith.constant 0.000000e+00 : f32
    %6 = vector.broadcast %cst_5 : f32 to vector<8x128xf32>
    %7 = arith.maximumf %5, %6 : vector<8x128xf32>
    %c0_6 = arith.constant 0 : index
    %c0_7 = arith.constant 0 : index
    %8 = vector.load %arg4[%c0_6, %c0_7] : memref<128x64xf32, #tpu.memory_space<vmem>>, vector<128x64xf32>
    %cst_8 = arith.constant dense<0.000000e+00> : vector<8x64xf32>
    %9 = tpu.matmul %7, %8, %cst_8 {dimension_numbers = #tpu.dot_dimension_numbers<[1], [0], [0], [1], [0, 0, 1, 1], [], []>} : vector<8x128xf32>, vector<128x64xf32>, vector<8x64xf32> -> vector<8x64xf32>
    %c0_9 = arith.constant 0 : index
    %c0_10 = arith.constant 0 : index
    %10 = vector.load %arg5[%c0_9, %c0_10] : memref<1x64xf32, #tpu.memory_space<vmem>>, vector<1x64xf32>
    %11 = vector.broadcast %10 : vector<1x64xf32> to vector<8x64xf32>
    %12 = arith.addf %9, %11 : vector<8x64xf32>
    %cst_11 = arith.constant 0.000000e+00 : f32
    %13 = vector.broadcast %cst_11 : f32 to vector<8x64xf32>
    %14 = arith.maximumf %12, %13 : vector<8x64xf32>
    %c0_12 = arith.constant 0 : index
    %c0_13 = arith.constant 0 : index
    %15 = vector.load %arg6[%c0_12, %c0_13] : memref<64x128xf32, #tpu.memory_space<vmem>>, vector<64x128xf32>
    %cst_14 = arith.constant dense<0.000000e+00> : vector<8x128xf32>
    %16 = tpu.matmul %14, %15, %cst_14 {dimension_numbers = #tpu.dot_dimension_numbers<[1], [0], [0], [1], [0, 0, 1, 1], [], []>} : vector<8x64xf32>, vector<64x128xf32>, vector<8x128xf32> -> vector<8x128xf32>
    %17 = vector.extract_strided_slice %16 {offsets = [0, 0], sizes = [8, 1], strides = [1, 1]} : vector<8x128xf32> to vector<8x1xf32>
    %c0_15 = arith.constant 0 : index
    %c0_16 = arith.constant 0 : index
    %18 = vector.load %arg7[%c0_15, %c0_16] : memref<1x1xf32, #tpu.memory_space<vmem>>, vector<1x1xf32>
    %19 = vector.broadcast %18 : vector<1x1xf32> to vector<8x1xf32>
    %20 = arith.addf %17, %19 : vector<8x1xf32>
    %21 = arith.negf %20 : vector<8x1xf32>
    %22 = math.exp %21 : vector<8x1xf32>
    %cst_17 = arith.constant 1.000000e+00 : f32
    %23 = vector.broadcast %cst_17 : f32 to vector<8x1xf32>
    %24 = arith.addf %23, %22 : vector<8x1xf32>
    %25 = arith.divf %23, %24 : vector<8x1xf32>
    %c0_18 = arith.constant 0 : index
    %c0_19 = arith.constant 0 : index
    %26 = vector.load %arg8[%c0_18, %c0_19] : memref<8x1xf32, #tpu.memory_space<vmem>>, vector<8x1xf32>
    tpu.vector_store %arg8[%c0_18, %c0_19], %25 {strides = array<i32>} : memref<8x1xf32, #tpu.memory_space<vmem>>, vector<8x1xf32>,
    return
  }
  func.func @transform_0(%arg0: i32) -> (i32, i32) {
    %c0_i32 = arith.constant 0 : i32
    %c0_i32_0 = arith.constant 0 : i32
    return %arg0, %c0_i32 : i32, i32
  }
  func.func @transform_1(%arg0: i32) -> (i32, i32) {
    %c0_i32 = arith.constant 0 : i32
    %c0_i32_0 = arith.constant 0 : i32
    %c0_i32_1 = arith.constant 0 : i32
    return %c0_i32, %c0_i32_0 : i32, i32
  }
  func.func @transform_2(%arg0: i32) -> (i32, i32) {
    %c0_i32 = arith.constant 0 : i32
    %c0_i32_0 = arith.constant 0 : i32
    %c0_i32_1 = arith.constant 0 : i32
    return %c0_i32, %c0_i32_0 : i32, i32
  }
  func.func @transform_3(%arg0: i32) -> (i32, i32) {
    %c0_i32 = arith.constant 0 : i32
    %c0_i32_0 = arith.constant 0 : i32
    %c0_i32_1 = arith.constant 0 : i32
    return %c0_i32, %c0_i32_0 : i32, i32
  }
  func.func @transform_4(%arg0: i32) -> (i32, i32) {
    %c0_i32 = arith.constant 0 : i32
    %c0_i32_0 = arith.constant 0 : i32
    %c0_i32_1 = arith.constant 0 : i32
    return %c0_i32, %c0_i32_0 : i32, i32
  }
  func.func @transform_5(%arg0: i32) -> (i32, i32) {
    %c0_i32 = arith.constant 0 : i32
    %c0_i32_0 = arith.constant 0 : i32
    %c0_i32_1 = arith.constant 0 : i32
    return %c0_i32, %c0_i32_0 : i32, i32
  }
  func.func @transform_6(%arg0: i32) -> (i32, i32) {
    %c0_i32 = arith.constant 0 : i32
    %c0_i32_0 = arith.constant 0 : i32
    %c0_i32_1 = arith.constant 0 : i32
    return %c0_i32, %c0_i32_0 : i32, i32
  }
  func.func @transform_7(%arg0: i32) -> (i32, i32) {
    %c0_i32 = arith.constant 0 : i32
    %c0_i32_0 = arith.constant 0 : i32
    return %arg0, %c0_i32 : i32, i32
  }
}

</mosaic_0001>

<bundles_post_ra>
// kernel: tpu_custom_call.1
= control target key start
LH: loop header
LB: loop body
LE: loop exit
PB: predicated region body
PF: predicated region fallthrough
CT: control target
= control target key end

     0   :  { %vm50_vm0 = vcmask 261120   ;;  %vm117_vm1 = vcmask 523264   ;;  %vm165_vm5 = vcmask 7168   ;;  %s324_s1 = inlined_call_operand.vmem [shape: bf16[32,128], index: 1, kind: input, shape index: {}]   ;;  %s325_s3 = inlined_call_operand.vmem [shape: f32[128,64], index: 3, kind: input, shape index: {}]   ;;  %s326_s0 = inlined_call_operand.vmem [shape: bf16[8,32], index: 0, kind: input, shape index: {}]   ;;  %s327_s2 = inlined_call_operand.vmem [shape: f32[1,128], index: 2, kind: input, shape index: {}]   ;;  %s328_s4 = inlined_call_operand.vmem [shape: f32[1,64], index: 4, kind: input, shape index: {}]   ;;  %s329_s5 = inlined_call_operand.vmem [shape: f32[64,128], index: 5, kind: input, shape index: {}]   ;;  %s330_s6 = inlined_call_operand.<no memory space> [shape: f32[1,1], index: 6, kind: input, shape index: {}]   ;;  %s331_s7 = inlined_call_operand.vmem [shape: f32[8,1], index: 7, kind: output, shape index: {}]  }
   0x1   :  { %v183_v0 = vld [vmem:[%s324_s1 + $0x8] sm:$0xff]  ;;  %v83_v1 = vld [vmem:[%s325_s3 + $0x78] sm:$0xff]  ;;  %v82_v2 = vld [vmem:[%s325_s3 + $0x70] sm:$0xff]  ;;  %v12_v32 = vstv %s330_s6 }
   0x2   :  { %60 = vmatpush.bf16.msra.mxu0 %v183_v0  ;;  %v182_v3 = vld [vmem:[%s324_s1] sm:$0xff]  ;;  %88 = vmatpush.msra.mxu1 %v83_v1  ;;  %v81_v4 = vld [vmem:[%s325_s3 + $0x68] sm:$0xff]  ;;  %v79_v7 = vld [vmem:[%s325_s3 + $0x58] sm:$0xff]  ;;  %13 = vst [vmem:[#allocation2] sm:$0x1] %v12_v32 }
   0x3   :  { %v80_v5 = vld [vmem:[%s325_s3 + $0x60] sm:$0xff]  ;;  %v78_v8 = vld [vmem:[%s325_s3 + $0x50] sm:$0xff]  ;;  %v77_v9 = vld [vmem:[%s325_s3 + $0x48] sm:$0xff] }
   0x4   :  { %89 = vmatpush.msra.mxu1 %v82_v2  ;;  %v29_v6 = vld [vmem:[%s326_s0] sm:$0xf]  ;;  %v75_v11 = vld [vmem:[%s325_s3 + $0x38] sm:$0xff]  ;;  %v74_v12 = vld [vmem:[%s325_s3 + $0x30] sm:$0xff] }
   0x5   :  { %v76_v10 = vld [vmem:[%s325_s3 + $0x40] sm:$0xff]  ;;  %v73_v13 = vld [vmem:[%s325_s3 + $0x28] sm:$0xff]  ;;  %v71_v15 = vld [vmem:[%s325_s3 + $0x18] sm:$0xff] }
   0x6   :  { %61 = vmatpush.bf16.msra.mxu0 %v182_v3  ;;  %90 = vmatpush.msra.mxu1 %v81_v4  ;;  %v72_v14 = vld [vmem:[%s325_s3 + $0x20] sm:$0xff]  ;;  %v70_v16 = vld [vmem:[%s325_s3 + $0x10] sm:$0xff]  ;;  %v69_v17 = vld [vmem:[%s325_s3 + $0x8] sm:$0xff] }
   0x7   :  { %v68_v18 = vld [vmem:[%s325_s3] sm:$0xff]  ;;  %v116_v19 = vld [vmem:[%s329_s5 + $0x38] sm:$0xff]  ;;  %v115_v20 = vld [vmem:[%s329_s5 + $0x30] sm:$0xff] }
   0x8   :  { %91 = vmatpush.msra.mxu1 %v80_v5  ;;  %129 = vmatpush.msra.mxu2 %v116_v19  ;;  %v114_v21 = vld [vmem:[%s329_s5 + $0x28] sm:$0xff]  ;;  %v113_v22 = vld [vmem:[%s329_s5 + $0x20] sm:$0xff]  ;;  %v112_v23 = vld [vmem:[%s329_s5 + $0x18] sm:$0xff] }
   0x9   :  { %179 = vmatmul.msk.bf16.vlgmr.msra.gmra.mxu0 %vm50_vm0, %v29_v6  ;;  %v184_v24 = vld [vmem:[%s327_s2] ss:$0 sm:$0xff]  ;;  %v111_v29 = vld [vmem:[%s329_s5 + $0x10] sm:$0xff]  ;;  %v110_v30 = vld [vmem:[%s329_s5 + $0x8] sm:$0xff] }
   0xa   :  { %92 = vmatpush.msra.mxu1 %v79_v7  ;;  %130 = vmatpush.msra.mxu2 %v115_v20  ;;  %v109_v31 = vld [vmem:[%s329_s5] sm:$0xff] }
   0xb   :  { %v185_v33 = vld [vmem:[%s328_s4] ss:$0 sm:$0xff] }
   0xc   :  { %93 = vmatpush.msra.mxu1 %v78_v8  ;;  %131 = vmatpush.msra.mxu2 %v114_v21  ;;  %v186_v37 = vld [vmem:[#allocation2] ss:$0 sm:$0xff] }
   0xe   :  { %94 = vmatpush.msra.mxu1 %v77_v9  ;;  %132 = vmatpush.msra.mxu2 %v113_v22 }
  0x10   :  { %95 = vmatpush.msra.mxu1 %v76_v10  ;;  %133 = vmatpush.msra.mxu2 %v112_v23 }
  0x12   :  { %96 = vmatpush.msra.mxu1 %v75_v11  ;;  %134 = vmatpush.msra.mxu2 %v111_v29 }
  0x14   :  { %97 = vmatpush.msra.mxu1 %v74_v12  ;;  %135 = vmatpush.msra.mxu2 %v110_v30 }
  0x16   :  { %98 = vmatpush.msra.mxu1 %v73_v13  ;;  %136 = vmatpush.msra.mxu2 %v109_v31 }
  0x18   :  { %99 = vmatpush.msra.mxu1 %v72_v14 }
  0x1a   :  { %100 = vmatpush.msra.mxu1 %v71_v15 }
  0x1c   :  { %101 = vmatpush.msra.mxu1 %v70_v16 }
  0x1e   :  { %102 = vmatpush.msra.mxu1 %v69_v17 }
  0x20   :  { %103 = vmatpush.msra.mxu1 %v68_v18 }
  0x86   :  { %v63_v25 = vpop.f32.mrf.mxu0 }
  0x87   :  { %v64_v26 = vadd.f32 %v184_v24, %v63_v25 }
  0x89   :  { %v67_v27 = vmax.f32 %v64_v26, 0.0 }
  0x8b   :  { %104 = vmatmul.f32.vlgmr.msra.gmra.mxu1 %v67_v27 }
  0x8e   :  { %v65_v28 = vpop.f32.mrf.mxu0 }
 0x108   :  { %v105_v34 = vpop.f32.mrf.mxu1 }
 0x109   :  { %v106_v35 = vadd.f32 %v185_v33, %v105_v34 }
 0x10b   :  { %v108_v36 = vmax.f32 %v106_v35, 0.0 }
 0x10d   :  { %180 = vmatmul.msk.f32.vlgmr.msra.gmra.mxu2 %vm117_vm1, %v108_v36 }
 0x190   :  { %v138_v38 = vpop.f32.mrf.mxu2 }
 0x191   :  { %v145_v39 = vadd.f32 %v186_v37, %v138_v38 }
 0x193   :  { %v181_v40 = vmul.f32 -1.442695, %v145_v39 }
 0x195   :  { %187 = vpow2.f32 %v181_v40 }
 0x19b   :  { %v188_v41 = vpop.eup %187 }
 0x19c   :  { %v149_v42 = vadd.f32 1.0, %v188_v41 }
 0x19e   :  { %189 = vrcp.f32 %v149_v42  ;;  %v161_v46 = vand.u32 2147483648, %v149_v42  ;;  %v159_v48 = vand.u32 2147483647, %v149_v42  ;;  %vm155_vm3 = vweird.f32 %v149_v42 }
 0x1a0   :  { %v162_v50 = vor.u32 1.1754944e-38, %v161_v46  ;;  %vm160_vm6 = vcmp.eq.f32.partialorder %v159_v48, 8.507059e+37 }
 0x1a4   :  { %v190_v43 = vpop.eup %189 }
 0x1a5   :  { %v151_v44 = vmul.f32 %v190_v43, %v149_v42  ;;  %vm156_vm2 = vweird.f32 %v190_v43 }
 0x1a6   :  { %vm157_vm4 = vmor %vm155_vm3, %vm156_vm2 }
 0x1a7   :  { %v152_v45 = vsub.f32 1.0, %v151_v44 }
 0x1a9   :  { %v153_v47 = vmul.f32 %v190_v43, %v152_v45 }
 0x1ab   :  { %v154_v49 = vadd.f32 %v190_v43, %v153_v47 }
 0x1ad   :  { %v158_v51 = vsel %vm157_vm4, %v190_v43, %v154_v49 }
 0x1ae   :  { %v163_v52 = vsel %vm160_vm6, %v162_v50, %v158_v51 }
 0x1af   :  { %166 = vst.msk [vmem:[%s331_s7] sm:$0xff] %vm165_vm5, %v163_v52 }

</bundles_post_ra>
